<compile_context>
chip_gen: v6e
topology: v6e:2x2x1
jax: 0.10.0
libtpu: 0.0.40
codegen_flags: <defaults>
</compile_context>

<pallas_src>
import numpy as np
import jax
import jax.numpy as jnp
from jax import lax
from jax.experimental import pallas as pl
from jax.experimental.pallas import tpu as pltpu

CHUNK = 8  # timesteps per register-resident chunk (one f32 (8,128) tile per store)


def _round_up(x, m):
    return ((x + m - 1) // m) * m


def make_lif_kernel(t_pad, n_real, beta, threshold, reset_mechanism):
    beta = float(beta)
    threshold = float(threshold)
    n_chunks = t_pad // CHUNK

    def kernel(x_ref, wt_ref, mem_ref, spk_ref, first_ref):
        n_pad = mem_ref.shape[1]

        # One batched MXU matmul for all timesteps: [Tpad, Ipad] @ [Ipad, Npad].
        # Written directly into mem_ref; the recurrence below updates it in place.
        mem_ref[...] = jnp.dot(x_ref[...], wt_ref[...],
                               preferred_element_type=jnp.float32)

        # Lane mask for the real neurons (padded lanes must never register a spike).
        lane = lax.broadcasted_iota(jnp.int32, (1, n_pad), 1)
        valid = lane < n_real                                   # [1, Npad] bool

        # Per-row timestep offsets within a chunk (hoisted, loop-invariant).
        row_iota = lax.broadcasted_iota(jnp.int32, (CHUNK, n_pad), 0)
        never = jnp.int32(t_pad)                                # sentinel: "no spike"

        def chunk_body(c, carry):
            mem_prev, first_vec = carry                          # [1,Npad] f32 / i32
            base = pl.multiple_of(c * CHUNK, CHUNK)

            # One full-tile load of the pre-computed currents for this chunk.
            cur_blk = mem_ref[pl.ds(base, CHUNK), :]             # [CHUNK, Npad]

            m = mem_prev
            mem_rows = []
            spk_rows = []
            for i in range(CHUNK):                               # static inner loop
                cur_t = cur_blk[i:i + 1, :]                      # register row
                b = beta * m + cur_t
                over = m > threshold                             # reset from PREVIOUS mem
                if reset_mechanism == "subtract":
                    m = jnp.where(over, b - threshold, b)
                elif reset_mechanism == "zero":
                    m = jnp.where(over, jnp.zeros_like(b), b)
                else:  # "none"
                    m = b
                s = ((m > threshold) & valid).astype(jnp.float32)  # fire() on new mem
                mem_rows.append(m)
                spk_rows.append(s)

            mem_blk = jnp.concatenate(mem_rows, axis=0)          # [CHUNK, Npad]
            spk_blk = jnp.concatenate(spk_rows, axis=0)          # [CHUNK, Npad]

            # One full-tile store per chunk for each output.
            mem_ref[pl.ds(base, CHUNK), :] = mem_blk
            spk_ref[pl.ds(base, CHUNK), :] = spk_blk

            # Per-lane first spiking timestep (running elementwise min).
            cand = jnp.where(spk_blk > 0.0, base + row_iota, never)
            first_vec = jnp.minimum(first_vec,
                                    jnp.min(cand, axis=0, keepdims=True))
            return m, first_vec

        mem0 = jnp.zeros((1, n_pad), jnp.float32)                # lif.init_leaky()
        first0 = jnp.full((1, n_pad), never, jnp.int32)
        _, first_vec = lax.fori_loop(0, n_chunks, chunk_body, (mem0, first0))
        first_ref[...] = first_vec

    return kernel


def run_lif_kernel(x2d, w, beta, threshold, reset_mechanism):
    """x2d: [T, num_input], w: [num_output, num_input] ->
       (mem [Tpad, Npad], spk [Tpad, Npad], first_step per lane [1, Npad])."""
    x2d = np.asarray(x2d, np.float32)
    w = np.asarray(w, np.float32)
    T, num_input = x2d.shape
    num_output = w.shape[0]

    # Pad T to a CHUNK multiple (exact chunked stores, no OOB) and I/N to 128 so all
    # VMEM rows are lane-dense (unmasked stores).  Zero padding is exact for the
    # matmul; padded lanes are masked out of the spike logic inside the kernel.
    t_pad = _round_up(max(T, CHUNK), CHUNK)
    i_pad = _round_up(num_input, 128)
    n_pad = _round_up(num_output, 128)

    xp = np.zeros((t_pad, i_pad), np.float32)
    xp[:T, :num_input] = x2d
    wtp = np.zeros((i_pad, n_pad), np.float32)
    wtp[:num_input, :num_output] = w.T

    # TODO(synk): for large num_input/num_output, cast x/W^T to bf16 (keeping
    # preferred_element_type=f32) for the v6e/v7x MXU; at toy sizes f32 keeps the
    # threshold comparisons exact.

    kernel = make_lif_kernel(t_pad, num_output, beta, threshold, reset_mechanism)

    mem_p, spk_p, first_p = pl.pallas_call(
        kernel,
        out_shape=(
            jax.ShapeDtypeStruct((t_pad, n_pad), jnp.float32),   # membrane trace
            jax.ShapeDtypeStruct((t_pad, n_pad), jnp.float32),   # spike trace
            jax.ShapeDtypeStruct((1, n_pad), jnp.int32),         # per-lane first spike
        ),
        in_specs=[
            pl.BlockSpec(memory_space=pltpu.MemorySpace.VMEM),   # x (whole slab)
            pl.BlockSpec(memory_space=pltpu.MemorySpace.VMEM),   # W^T
        ],
        out_specs=(
            pl.BlockSpec(memory_space=pltpu.MemorySpace.VMEM),
            pl.BlockSpec(memory_space=pltpu.MemorySpace.VMEM),
            pl.BlockSpec(memory_space=pltpu.MemorySpace.VMEM),
        ),
    )(jnp.asarray(xp), jnp.asarray(wtp))
    return mem_p, spk_p, first_p


def net_forward(x, w, beta, threshold, reset_mechanism="subtract", seed=123):
    x = np.asarray(x, np.float32)
    T, B, num_input = x.shape
    assert B == 1, "reference module indexes spk[0]; batch must be 1"
    num_output = int(np.asarray(w).shape[0])

    mem_p, spk_p, first_p = run_lif_kernel(x.reshape(T, num_input), w,
                                           beta, threshold, reset_mechanism)
    jax.block_until_ready((mem_p, spk_p, first_p))

    # Single device->host transfer; everything else is host-side bookkeeping that has
    # no clean Pallas equivalent (data-dependent break, RNG over spiking neurons,
    # print, pad-to-255).
    mem_np, spk_np, first_np = jax.device_get((mem_p, spk_p, first_p))
    mem = mem_np[:T, :num_output]
    spk = spk_np[:T, :num_output]
    first_step = int(first_np.min())
    spiked = first_step < T

    if not spiked:
        # TODO(synk): reference code leaves `random_neuron` undefined (NameError) if
        # no neuron ever spikes; we return -1 instead of faking the crash.
        spk3d = jnp.asarray(spk.reshape(T, B, num_output))
        mem3d = jnp.asarray(mem.reshape(T, B, num_output))
        return spk3d, mem3d, -1, T - 1

    neurons_that_spiked = np.nonzero(spk[first_step] > 0)[0]
    rng = np.random.default_rng(seed)          # deterministic stand-in for torch RNG
    random_neuron = int(neurons_that_spiked[rng.integers(0, len(neurons_that_spiked))])
    print(f"Neuron {random_neuron} spiked")

    L = max(255, first_step + 1)               # pad records to 255 as the reference does
    spk_rec = np.zeros((L, B, num_output), np.float32)
    mem_rec = np.zeros((L, B, num_output), np.float32)
    spk_rec[:first_step, 0, :] = spk[:first_step]
    mem_rec[:first_step, 0, :] = mem[:first_step]
    spk_rec[first_step, 0, random_neuron] = 1.0  # break-step: one-hot spk, zero mem

    return jnp.asarray(spk_rec), jnp.asarray(mem_rec), random_neuron, first_step


if __name__ == "__main__":
    # Small shapes consistent with the module: T time steps, batch=1 row per step.
    T, B, num_input, num_output = 8, 1, 32, 32
    beta, threshold, reset_mechanism = 0.9, 0.5, "subtract"

    key = jax.random.PRNGKey(0)
    kx, _ = jax.random.split(key)
    x = jax.random.uniform(kx, (T, B, num_input), dtype=jnp.float32)

    # fc1 weight ~ U[0, 1), deterministic (mirrors torch uniform_ with seed 42).
    w = jax.random.uniform(jax.random.PRNGKey(42), (num_output, num_input),
                           dtype=jnp.float32)

    spk_rec, mem_rec, random_neuron, step = net_forward(
        x, w, beta, threshold, reset_mechanism)
    jax.block_until_ready((spk_rec, mem_rec))

    assert spk_rec.shape[1:] == (B, num_output)
    assert mem_rec.shape == spk_rec.shape
    print("KERNEL_OK")
</pallas_src>

<mosaic_0001>
module attributes {stable_mosaic.version = 11 : i64} {
  func.func @kernel(%arg0: memref<8x128xf32, #tpu.memory_space<vmem>>, %arg1: memref<128x128xf32, #tpu.memory_space<vmem>>, %arg2: memref<8x128xf32, #tpu.memory_space<vmem>>, %arg3: memref<8x128xf32, #tpu.memory_space<vmem>>, %arg4: memref<1x128xi32, #tpu.memory_space<vmem>>) attributes {dimension_semantics = [], scalar_prefetch = 0 : i64, scratch_operands = 0 : i64, tpu.core_type = #tpu.core_type<tc>} {
    %c0 = arith.constant 0 : index
    %c0_0 = arith.constant 0 : index
    %0 = vector.load %arg0[%c0, %c0_0] : memref<8x128xf32, #tpu.memory_space<vmem>>, vector<8x128xf32>
    %c0_1 = arith.constant 0 : index
    %c0_2 = arith.constant 0 : index
    %1 = vector.load %arg1[%c0_1, %c0_2] : memref<128x128xf32, #tpu.memory_space<vmem>>, vector<128x128xf32>
    %cst = arith.constant dense<0.000000e+00> : vector<8x128xf32>
    %2 = tpu.matmul %0, %1, %cst {dimension_numbers = #tpu.dot_dimension_numbers<[1], [0], [0], [1], [0, 0, 1, 1], [], []>} : vector<8x128xf32>, vector<128x128xf32>, vector<8x128xf32> -> vector<8x128xf32>
    %c0_3 = arith.constant 0 : index
    %c0_4 = arith.constant 0 : index
    %3 = vector.load %arg2[%c0_3, %c0_4] : memref<8x128xf32, #tpu.memory_space<vmem>>, vector<8x128xf32>
    tpu.vector_store %arg2[%c0_3, %c0_4], %2 {strides = array<i32>} : memref<8x128xf32, #tpu.memory_space<vmem>>, vector<8x128xf32>,
    %4 = tpu.iota {dimensions = array<i32: 1>} : vector<1x128xi32>
    %c32_i32 = arith.constant 32 : i32
    %5 = vector.broadcast %c32_i32 : i32 to vector<1x128xi32>
    %6 = arith.cmpi slt, %4, %5 : vector<1x128xi32>
    %7 = tpu.iota {dimensions = array<i32: 0>} : vector<8x128xi32>
    %cst_5 = arith.constant 0.000000e+00 : f32
    %8 = vector.broadcast %cst_5 : f32 to vector<1x128xf32>
    %c8_i32 = arith.constant 8 : i32
    %9 = vector.broadcast %c8_i32 : i32 to vector<1x128xi32>
    %c8_i32_6 = arith.constant 8 : i32
    %c0_i32 = arith.constant 0 : i32
    %c8_i32_7 = arith.constant 8 : i32
    %10 = arith.muli %c0_i32, %c8_i32_7 : i32
    %11 = tpu.assume_multiple %10, 8 : i32
    %12 = arith.index_cast %11 : i32 to index
    %c0_8 = arith.constant 0 : index
    %13 = vector.load %arg2[%12, %c0_8] : memref<8x128xf32, #tpu.memory_space<vmem>>, vector<8x128xf32>
    %14 = vector.extract_strided_slice %13 {offsets = [0, 0], sizes = [1, 128], strides = [1, 1]} : vector<8x128xf32> to vector<1x128xf32>
    %cst_9 = arith.constant 0.899999976 : f32
    %15 = vector.broadcast %cst_9 : f32 to vector<1x128xf32>
    %16 = arith.mulf %15, %8 : vector<1x128xf32>
    %17 = arith.addf %16, %14 : vector<1x128xf32>
    %cst_10 = arith.constant 5.000000e-01 : f32
    %18 = vector.broadcast %cst_10 : f32 to vector<1x128xf32>
    %19 = arith.cmpf ogt, %8, %18 : vector<1x128xf32>
    %cst_11 = arith.constant 5.000000e-01 : f32
    %20 = vector.broadcast %cst_11 : f32 to vector<1x128xf32>
    %21 = arith.subf %17, %20 : vector<1x128xf32>
    %22 = arith.select %19, %21, %17 : vector<1x128xi1>, vector<1x128xf32>
    %cst_12 = arith.constant 5.000000e-01 : f32
    %23 = vector.broadcast %cst_12 : f32 to vector<1x128xf32>
    %24 = arith.cmpf ogt, %22, %23 : vector<1x128xf32>
    %25 = arith.andi %24, %6 : vector<1x128xi1>
    %26 = arith.extui %25 : vector<1x128xi1> to vector<1x128xi32>
    %27 = arith.sitofp %26 : vector<1x128xi32> to vector<1x128xf32>
    %28 = vector.extract_strided_slice %13 {offsets = [1, 0], sizes = [1, 128], strides = [1, 1]} : vector<8x128xf32> to vector<1x128xf32>
    %cst_13 = arith.constant 0.899999976 : f32
    %29 = vector.broadcast %cst_13 : f32 to vector<1x128xf32>
    %30 = arith.mulf %29, %22 : vector<1x128xf32>
    %31 = arith.addf %30, %28 : vector<1x128xf32>
    %cst_14 = arith.constant 5.000000e-01 : f32
    %32 = vector.broadcast %cst_14 : f32 to vector<1x128xf32>
    %33 = arith.cmpf ogt, %22, %32 : vector<1x128xf32>
    %cst_15 = arith.constant 5.000000e-01 : f32
    %34 = vector.broadcast %cst_15 : f32 to vector<1x128xf32>
    %35 = arith.subf %31, %34 : vector<1x128xf32>
    %36 = arith.select %33, %35, %31 : vector<1x128xi1>, vector<1x128xf32>
    %cst_16 = arith.constant 5.000000e-01 : f32
    %37 = vector.broadcast %cst_16 : f32 to vector<1x128xf32>
    %38 = arith.cmpf ogt, %36, %37 : vector<1x128xf32>
    %39 = arith.andi %38, %6 : vector<1x128xi1>
    %40 = arith.extui %39 : vector<1x128xi1> to vector<1x128xi32>
    %41 = arith.sitofp %40 : vector<1x128xi32> to vector<1x128xf32>
    %42 = vector.extract_strided_slice %13 {offsets = [2, 0], sizes = [1, 128], strides = [1, 1]} : vector<8x128xf32> to vector<1x128xf32>
    %cst_17 = arith.constant 0.899999976 : f32
    %43 = vector.broadcast %cst_17 : f32 to vector<1x128xf32>
    %44 = arith.mulf %43, %36 : vector<1x128xf32>
    %45 = arith.addf %44, %42 : vector<1x128xf32>
    %cst_18 = arith.constant 5.000000e-01 : f32
    %46 = vector.broadcast %cst_18 : f32 to vector<1x128xf32>
    %47 = arith.cmpf ogt, %36, %46 : vector<1x128xf32>
    %cst_19 = arith.constant 5.000000e-01 : f32
    %48 = vector.broadcast %cst_19 : f32 to vector<1x128xf32>
    %49 = arith.subf %45, %48 : vector<1x128xf32>
    %50 = arith.select %47, %49, %45 : vector<1x128xi1>, vector<1x128xf32>
    %cst_20 = arith.constant 5.000000e-01 : f32
    %51 = vector.broadcast %cst_20 : f32 to vector<1x128xf32>
    %52 = arith.cmpf ogt, %50, %51 : vector<1x128xf32>
    %53 = arith.andi %52, %6 : vector<1x128xi1>
    %54 = arith.extui %53 : vector<1x128xi1> to vector<1x128xi32>
    %55 = arith.sitofp %54 : vector<1x128xi32> to vector<1x128xf32>
    %56 = vector.extract_strided_slice %13 {offsets = [3, 0], sizes = [1, 128], strides = [1, 1]} : vector<8x128xf32> to vector<1x128xf32>
    %cst_21 = arith.constant 0.899999976 : f32
    %57 = vector.broadcast %cst_21 : f32 to vector<1x128xf32>
    %58 = arith.mulf %57, %50 : vector<1x128xf32>
    %59 = arith.addf %58, %56 : vector<1x128xf32>
    %cst_22 = arith.constant 5.000000e-01 : f32
    %60 = vector.broadcast %cst_22 : f32 to vector<1x128xf32>
    %61 = arith.cmpf ogt, %50, %60 : vector<1x128xf32>
    %cst_23 = arith.constant 5.000000e-01 : f32
    %62 = vector.broadcast %cst_23 : f32 to vector<1x128xf32>
    %63 = arith.subf %59, %62 : vector<1x128xf32>
    %64 = arith.select %61, %63, %59 : vector<1x128xi1>, vector<1x128xf32>
    %cst_24 = arith.constant 5.000000e-01 : f32
    %65 = vector.broadcast %cst_24 : f32 to vector<1x128xf32>
    %66 = arith.cmpf ogt, %64, %65 : vector<1x128xf32>
    %67 = arith.andi %66, %6 : vector<1x128xi1>
    %68 = arith.extui %67 : vector<1x128xi1> to vector<1x128xi32>
    %69 = arith.sitofp %68 : vector<1x128xi32> to vector<1x128xf32>
    %70 = vector.extract_strided_slice %13 {offsets = [4, 0], sizes = [1, 128], strides = [1, 1]} : vector<8x128xf32> to vector<1x128xf32>
    %cst_25 = arith.constant 0.899999976 : f32
    %71 = vector.broadcast %cst_25 : f32 to vector<1x128xf32>
    %72 = arith.mulf %71, %64 : vector<1x128xf32>
    %73 = arith.addf %72, %70 : vector<1x128xf32>
    %cst_26 = arith.constant 5.000000e-01 : f32
    %74 = vector.broadcast %cst_26 : f32 to vector<1x128xf32>
    %75 = arith.cmpf ogt, %64, %74 : vector<1x128xf32>
    %cst_27 = arith.constant 5.000000e-01 : f32
    %76 = vector.broadcast %cst_27 : f32 to vector<1x128xf32>
    %77 = arith.subf %73, %76 : vector<1x128xf32>
    %78 = arith.select %75, %77, %73 : vector<1x128xi1>, vector<1x128xf32>
    %cst_28 = arith.constant 5.000000e-01 : f32
    %79 = vector.broadcast %cst_28 : f32 to vector<1x128xf32>
    %80 = arith.cmpf ogt, %78, %79 : vector<1x128xf32>
    %81 = arith.andi %80, %6 : vector<1x128xi1>
    %82 = arith.extui %81 : vector<1x128xi1> to vector<1x128xi32>
    %83 = arith.sitofp %82 : vector<1x128xi32> to vector<1x128xf32>
    %84 = vector.extract_strided_slice %13 {offsets = [5, 0], sizes = [1, 128], strides = [1, 1]} : vector<8x128xf32> to vector<1x128xf32>
    %cst_29 = arith.constant 0.899999976 : f32
    %85 = vector.broadcast %cst_29 : f32 to vector<1x128xf32>
    %86 = arith.mulf %85, %78 : vector<1x128xf32>
    %87 = arith.addf %86, %84 : vector<1x128xf32>
    %cst_30 = arith.constant 5.000000e-01 : f32
    %88 = vector.broadcast %cst_30 : f32 to vector<1x128xf32>
    %89 = arith.cmpf ogt, %78, %88 : vector<1x128xf32>
    %cst_31 = arith.constant 5.000000e-01 : f32
    %90 = vector.broadcast %cst_31 : f32 to vector<1x128xf32>
    %91 = arith.subf %87, %90 : vector<1x128xf32>
    %92 = arith.select %89, %91, %87 : vector<1x128xi1>, vector<1x128xf32>
    %cst_32 = arith.constant 5.000000e-01 : f32
    %93 = vector.broadcast %cst_32 : f32 to vector<1x128xf32>
    %94 = arith.cmpf ogt, %92, %93 : vector<1x128xf32>
    %95 = arith.andi %94, %6 : vector<1x128xi1>
    %96 = arith.extui %95 : vector<1x128xi1> to vector<1x128xi32>
    %97 = arith.sitofp %96 : vector<1x128xi32> to vector<1x128xf32>
    %98 = vector.extract_strided_slice %13 {offsets = [6, 0], sizes = [1, 128], strides = [1, 1]} : vector<8x128xf32> to vector<1x128xf32>
    %cst_33 = arith.constant 0.899999976 : f32
    %99 = vector.broadcast %cst_33 : f32 to vector<1x128xf32>
    %100 = arith.mulf %99, %92 : vector<1x128xf32>
    %101 = arith.addf %100, %98 : vector<1x128xf32>
    %cst_34 = arith.constant 5.000000e-01 : f32
    %102 = vector.broadcast %cst_34 : f32 to vector<1x128xf32>
    %103 = arith.cmpf ogt, %92, %102 : vector<1x128xf32>
    %cst_35 = arith.constant 5.000000e-01 : f32
    %104 = vector.broadcast %cst_35 : f32 to vector<1x128xf32>
    %105 = arith.subf %101, %104 : vector<1x128xf32>
    %106 = arith.select %103, %105, %101 : vector<1x128xi1>, vector<1x128xf32>
    %cst_36 = arith.constant 5.000000e-01 : f32
    %107 = vector.broadcast %cst_36 : f32 to vector<1x128xf32>
    %108 = arith.cmpf ogt, %106, %107 : vector<1x128xf32>
    %109 = arith.andi %108, %6 : vector<1x128xi1>
    %110 = arith.extui %109 : vector<1x128xi1> to vector<1x128xi32>
    %111 = arith.sitofp %110 : vector<1x128xi32> to vector<1x128xf32>
    %112 = vector.extract_strided_slice %13 {offsets = [7, 0], sizes = [1, 128], strides = [1, 1]} : vector<8x128xf32> to vector<1x128xf32>
    %cst_37 = arith.constant 0.899999976 : f32
    %113 = vector.broadcast %cst_37 : f32 to vector<1x128xf32>
    %114 = arith.mulf %113, %106 : vector<1x128xf32>
    %115 = arith.addf %114, %112 : vector<1x128xf32>
    %cst_38 = arith.constant 5.000000e-01 : f32
    %116 = vector.broadcast %cst_38 : f32 to vector<1x128xf32>
    %117 = arith.cmpf ogt, %106, %116 : vector<1x128xf32>
    %cst_39 = arith.constant 5.000000e-01 : f32
    %118 = vector.broadcast %cst_39 : f32 to vector<1x128xf32>
    %119 = arith.subf %115, %118 : vector<1x128xf32>
    %120 = arith.select %117, %119, %115 : vector<1x128xi1>, vector<1x128xf32>
    %cst_40 = arith.constant 5.000000e-01 : f32
    %121 = vector.broadcast %cst_40 : f32 to vector<1x128xf32>
    %122 = arith.cmpf ogt, %120, %121 : vector<1x128xf32>
    %123 = arith.andi %122, %6 : vector<1x128xi1>
    %124 = arith.extui %123 : vector<1x128xi1> to vector<1x128xi32>
    %125 = arith.sitofp %124 : vector<1x128xi32> to vector<1x128xf32>
    %126 = tpu.concatenate %22, %36, %50, %64, %78, %92, %106, %120 in 0 : vector<1x128xf32>, vector<1x128xf32>, vector<1x128xf32>, vector<1x128xf32>, vector<1x128xf32>, vector<1x128xf32>, vector<1x128xf32>, vector<1x128xf32> -> vector<8x128xf32>
    %127 = tpu.concatenate %27, %41, %55, %69, %83, %97, %111, %125 in 0 : vector<1x128xf32>, vector<1x128xf32>, vector<1x128xf32>, vector<1x128xf32>, vector<1x128xf32>, vector<1x128xf32>, vector<1x128xf32>, vector<1x128xf32> -> vector<8x128xf32>
    %128 = arith.index_cast %11 : i32 to index
    %c0_41 = arith.constant 0 : index
    %129 = vector.load %arg2[%128, %c0_41] : memref<8x128xf32, #tpu.memory_space<vmem>>, vector<8x128xf32>
    tpu.vector_store %arg2[%128, %c0_41], %126 {strides = array<i32>} : memref<8x128xf32, #tpu.memory_space<vmem>>, vector<8x128xf32>,
    %130 = arith.index_cast %11 : i32 to index
    %c0_42 = arith.constant 0 : index
    %131 = vector.load %arg3[%130, %c0_42] : memref<8x128xf32, #tpu.memory_space<vmem>>, vector<8x128xf32>
    tpu.vector_store %arg3[%130, %c0_42], %127 {strides = array<i32>} : memref<8x128xf32, #tpu.memory_space<vmem>>, vector<8x128xf32>,
    %cst_43 = arith.constant 0.000000e+00 : f32
    %132 = vector.broadcast %cst_43 : f32 to vector<8x128xf32>
    %133 = arith.cmpf ogt, %127, %132 : vector<8x128xf32>
    %134 = vector.broadcast %11 : i32 to vector<8x128xi32>
    %135 = arith.addi %134, %7 : vector<8x128xi32>
    %136 = vector.broadcast %c8_i32_6 : i32 to vector<8x128xi32>
    %137 = arith.select %133, %135, %136 : vector<8x128xi1>, vector<8x128xi32>
    %cst_44 = arith.constant dense<2147483647> : vector<128xi32>
    %138 = vector.multi_reduction <minsi>, %137, %cst_44 [0] : vector<8x128xi32> to vector<128xi32>
    %139 = vector.shape_cast %138 : vector<128xi32> to vector<1x128xi32>
    %140 = arith.minsi %9, %139 : vector<1x128xi32>
    %c1_i32 = arith.constant 1 : i32
    %c0_45 = arith.constant 0 : index
    %c0_46 = arith.constant 0 : index
    %141 = vector.load %arg4[%c0_45, %c0_46] : memref<1x128xi32, #tpu.memory_space<vmem>>, vector<1x128xi32>
    tpu.vector_store %arg4[%c0_45, %c0_46], %140 {strides = array<i32>} : memref<1x128xi32, #tpu.memory_space<vmem>>, vector<1x128xi32>,
    return
  }
}

</mosaic_0001>

<bundles_post_ra>
// kernel: tpu_custom_call.1
= control target key start
LH: loop header
LB: loop body
LE: loop exit
PB: predicated region body
PF: predicated region fallthrough
CT: control target
= control target key end

     0   :  { %10 = vsyncpa [#allocation3], 0  ;;  %s679_s0 = inlined_call_operand.hbm [shape: f32[8,128], index: 0, kind: input, shape index: {}]   ;;  %s680_s1 = inlined_call_operand.hbm [shape: f32[128,128], index: 1, kind: input, shape index: {}]   ;;  %s681_s2 = inlined_call_operand.hbm [shape: f32[8,128], index: 2, kind: output, shape index: {0}]   ;;  %s682_s3 = inlined_call_operand.hbm [shape: f32[8,128], index: 3, kind: output, shape index: {1}]   ;;  %s683_s4 = inlined_call_operand.hbm [shape: s32[1,128], index: 4, kind: output, shape index: {2}]  }
   0x1   :  { %11 = vsyncpa [#allocation6], 0 }
   0x2   :  { %12 = vsyncpa [#allocation4], 0 }
   0x3   :  { %13 = vsyncpa [#allocation9], 0  ;;  %s524_s15 = smov [#allocation2]   ;;  %s525_s17 = smov [#allocation5]  }
   0x4   :  { %s20_s16 = sshll.u32 %s524_s15, 4  ;;  %s29_s18 = sshll.u32 %s525_s17, 4  ;;  %s21_s16 = int_to_ptr.vmem [resolvable:$true] %s20_s16  ;;  %s30_s18 = int_to_ptr.vmem [resolvable:$true] %s29_s18 }
   0x5   :  { %s424_s19 = scalar_lea.vmem %s21_s16, 128  ;;  %p429_p1 = scmp.lt.s32.totalorder %s21_s16, %s21_s16 }
   0x6   :  { %p425_p0 = scmp.ne.s32.totalorder %s21_s16, %s424_s19  ;;  %p430_p2 = scmp.lt.s32.totalorder %s424_s19, %s424_s19 }
   0x8   :  { %p431_p3 = por %p430_p2, %p429_p1 }
   0xa   :  { %p432_p4 = pnand %p431_p3, %p425_p0 }
   0xc   :  { %435 = shalt.err (!%p432_p4)
}
   0xd   :  { %23 = dma.hbm_to_vmem [thread:$0]  %s679_s0, 128, %s21_s16, [#allocation3]  }
   0xe   :  { %s444_s22 = scalar_lea.vmem %s30_s18, 2048  ;;  %p449_p6 = scmp.lt.s32.totalorder %s30_s18, %s30_s18 }
   0xf   :  { %p445_p5 = scmp.ne.s32.totalorder %s30_s18, %s444_s22  ;;  %p450_p7 = scmp.lt.s32.totalorder %s444_s22, %s444_s22 }
  0x11   :  { %p451_p8 = por %p450_p7, %p449_p6 }
  0x13   :  { %p452_p9 = pnand %p451_p8, %p445_p5 }
  0x15   :  { %455 = shalt.err (!%p452_p9)
}
  0x16   :  { %s526_s23 = smov 128   ;;  %s527_s24 = smov 8  }
  0x17   :  { %35 = dma.hbm_to_vmem [thread:$0]  %s680_s1, 2048, %s30_s18, [#allocation6], %s526_s23, %s526_s23, %s527_s24  }
  0x18   :  { %516 = dma.done.wait [#allocation3], 128  }
  0x19   :  { %517 = vsyncadd [#allocation3], 4294967168 }
  0x1a   :  { %518 = dma.done.wait [#allocation6], 2048  }
  0x1b   :  { %519 = vsyncadd [#allocation6], 4294965248  ;;  %v528_v0 = vmov 0.0   ;;  %vm529_vm0 = vmmov 0   ;;  %v58_v1 = vld [vmem:[#allocation5 + $0x78] sm:$0xff]  ;;  %v57_v2 = vld [vmem:[#allocation5 + $0x70] sm:$0xff]  ;;  %v130_v40 = vlaneseq }
  0x1c   :  { %372 = vmatprep.subr.mxu0 %v528_v0  ;;  %404 = vmatprep.mubr.msk.f32.mxu0 %vm529_vm0, %v528_v0  ;;  %v56_v3 = vld [vmem:[#allocation5 + $0x68] sm:$0xff]  ;;  %v55_v4 = vld [vmem:[#allocation5 + $0x60] sm:$0xff]  ;;  %v54_v5 = vld [vmem:[#allocation5 + $0x58] sm:$0xff]  ;;  %vm236_vm11 = vcmask 1040384   ;;  %vm238_vm13 = vcmask 1041408   ;;  %vm240_vm14 = vcmask 1042432  }
  0x1d   :  { %373 = vmatpush3.msra.mxu0 %v58_v1  ;;  %v53_v6 = vld [vmem:[#allocation5 + $0x50] sm:$0xff]  ;;  %v52_v7 = vld [vmem:[#allocation5 + $0x48] sm:$0xff]  ;;  %v51_v8 = vld [vmem:[#allocation5 + $0x40] sm:$0xff]  ;;  %v604_v44 = vand.u32 127, %v130_v40  ;;  %vm242_vm15 = vcmask 1043456   ;;  %s530_s0 = smov [#allocation7]  }
  0x1e   :  { %374 = vmatprep.subr.mxu0 %v528_v0  ;;  %v50_v9 = vld [vmem:[#allocation5 + $0x38] sm:$0xff]  ;;  %v49_v10 = vld [vmem:[#allocation5 + $0x30] sm:$0xff]  ;;  %v48_v11 = vld [vmem:[#allocation5 + $0x28] sm:$0xff]  ;;  %s302_s1 = sshll.u32 %s530_s0, 4  ;;  %s531_s27 = smov [#allocation8]   ;;  %s303_s1 = int_to_ptr.vmem [resolvable:$true] %s302_s1 }
  0x1f   :  { %375 = vmatpush3.msra.mxu0 %v57_v2  ;;  %v47_v12 = vld [vmem:[#allocation5 + $0x20] sm:$0xff]  ;;  %v46_v13 = vld [vmem:[#allocation5 + $0x18] sm:$0xff]  ;;  %v45_v14 = vld [vmem:[#allocation5 + $0x10] sm:$0xff]  ;;  %vm132_vm6 = vcmp.lt.s32.totalorder %v604_v44, 32  ;;  %s312_s28 = sshll.u32 %s531_s27, 4  ;;  %s456_s29 = scalar_lea.vmem %s303_s1, 128  ;;  %s313_s28 = int_to_ptr.vmem [resolvable:$true] %s312_s28 }
  0x20   :  { %376 = vmatprep.subr.mxu0 %v528_v0  ;;  %v44_v15 = vld [vmem:[#allocation5 + $0x8] sm:$0xff]  ;;  %v43_v16 = vld [vmem:[#allocation5] sm:$0xff]  ;;  %v42_v17 = vld [vmem:[#allocation2] sm:$0xff]  ;;  %p457_p10 = scmp.ne.s32.totalorder %s303_s1, %s456_s29  ;;  %p461_p11 = scmp.lt.s32.totalorder %s303_s1, %s303_s1 }
  0x21   :  { %377 = vmatpush3.msra.mxu0 %v56_v3  ;;  %p462_p12 = scmp.lt.s32.totalorder %s456_s29, %s456_s29 }
  0x22   :  { %378 = vmatprep.subr.mxu0 %v528_v0 }
  0x23   :  { %379 = vmatpush3.msra.mxu0 %v55_v4  ;;  %p463_p13 = por %p462_p12, %p461_p11 }
  0x24   :  { %380 = vmatprep.subr.mxu0 %v528_v0 }
  0x25   :  { %381 = vmatpush3.msra.mxu0 %v54_v5  ;;  %p464_p0 = pnand %p463_p13, %p457_p10 }
  0x26   :  { %382 = vmatprep.subr.mxu0 %v528_v0 }
  0x27   :  { %383 = vmatpush3.msra.mxu0 %v53_v6 }
  0x28   :  { %384 = vmatprep.subr.mxu0 %v528_v0 }
  0x29   :  { %385 = vmatpush3.msra.mxu0 %v52_v7 }
  0x2a   :  { %386 = vmatprep.subr.mxu0 %v528_v0 }
  0x2b   :  { %387 = vmatpush3.msra.mxu0 %v51_v8 }
  0x2c   :  { %388 = vmatprep.subr.mxu0 %v528_v0 }
  0x2d   :  { %389 = vmatpush3.msra.mxu0 %v50_v9 }
  0x2e   :  { %390 = vmatprep.subr.mxu0 %v528_v0 }
  0x2f   :  { %391 = vmatpush3.msra.mxu0 %v49_v10 }
  0x30   :  { %392 = vmatprep.subr.mxu0 %v528_v0 }
  0x31   :  { %393 = vmatpush3.msra.mxu0 %v48_v11 }
  0x32   :  { %394 = vmatprep.subr.mxu0 %v528_v0 }
  0x33   :  { %395 = vmatpush3.msra.mxu0 %v47_v12 }
  0x34   :  { %396 = vmatprep.subr.mxu0 %v528_v0 }
  0x35   :  { %397 = vmatpush3.msra.mxu0 %v46_v13 }
  0x36   :  { %398 = vmatprep.subr.mxu0 %v528_v0 }
  0x37   :  { %399 = vmatpush3.msra.mxu0 %v45_v14 }
  0x38   :  { %400 = vmatprep.subr.mxu0 %v528_v0 }
  0x39   :  { %401 = vmatpush3.msra.mxu0 %v44_v15 }
  0x3a   :  { %402 = vmatprep.subr.mxu0 %v528_v0 }
  0x3b   :  { %403 = vmatpush3.msra.mxu0 %v43_v16 }
  0x3c   :  { %405 = vmatmul.mubr.f32.vlgmr.msra.gmra.mxu0 %v42_v17 }
  0xfc   :  { %v581_v18 = vpop.f32.mrf.mxu0 }
  0xfd   :  { %v144_v19 = vmul.f32 0.9, %v581_v18  ;;  %v146_v20 = vrot.slane %v581_v18, 1  ;;  %vm140_vm1 = vcmp.gt.f32.partialorder %v581_v18, 0.5  ;;  %v156_v26 = vrot.slane %v581_v18, 2 }
  0xfe   :  { %v406_v21 = vpop.f32.mrf.mxu0  ;;  %v166_v31 = vrot.slane %v581_v18, 3  ;;  %v176_v36 = vrot.slane %v581_v18, 4  ;;  %v186_v42 = vrot.slane %v581_v18, 5  ;;  %v196_v48 = vrot.slane %v581_v18, 6  ;;  %vm621_vm9 = vmand %vm140_vm1, %vm132_vm6 }
  0xff   :  { %v148_v22 = vadd.f32 %v146_v20, %v144_v19  ;;  %v206_v58 = vrot.slane %v581_v18, 7  ;;  %v340_v4 = vsel %vm621_vm9, 1.0, %v528_v0 }
 0x101   :  { %v341_v23 = vadd.f32 -0.5, %v148_v22 }
 0x103   :  { %v150_v24 = vsel %vm140_vm1, %v341_v23, %v148_v22  ;;  %vm244_vm1 = vcmask 1044480  }
 0x104   :  { %v155_v25 = vmul.f32 0.9, %v150_v24  ;;  %vm151_vm2 = vcmp.gt.f32.partialorder %v150_v24, 0.5  ;;  %v216_v52 = vrot.slane %v150_v24, 7 }
 0x105   :  { %vm152_vm7 = vmand %vm151_vm2, %vm132_vm6 }
 0x106   :  { %v158_v27 = vadd.f32 %v156_v26, %v155_v25  ;;  %v342_v53 = vsel %vm152_vm7, 1.0, %v528_v0  ;;  %v237_v62 = vsel %vm236_vm11, %v581_v18, %v216_v52 }
 0x107   :  { %v251_v60 = vrot.slane %v342_v53, 7 }
 0x108   :  { %v343_v28 = vadd.f32 -0.5, %v158_v27 }
 0x109   :  { %v271_v13 = vsel %vm236_vm11, %v340_v4, %v251_v60 }
 0x10a   :  { %v160_v29 = vsel %vm151_vm2, %v343_v28, %v158_v27  ;;  %v134_v27 = vshrl.u32 %v130_v40, 7 }
 0x10b   :  { %v165_v30 = vmul.f32 0.9, %v160_v29  ;;  %vm161_vm3 = vcmp.gt.f32.partialorder %v160_v29, 0.5  ;;  %v219_v56 = vrot.slane %v160_v29, 6 }
 0x10c   :  { %vm162_vm8 = vmand %vm161_vm3, %vm132_vm6 }
 0x10d   :  { %v168_v32 = vadd.f32 %v166_v31, %v165_v30  ;;  %v344_v54 = vsel %vm162_vm8, 1.0, %v528_v0  ;;  %v239_v7 = vsel %vm238_vm13, %v237_v62, %v219_v56 }
 0x10e   :  { %v254_v2 = vrot.slane %v344_v54, 6 }
 0x10f   :  { %v345_v33 = vadd.f32 -0.5, %v168_v32 }
 0x110   :  { %v272_v17 = vsel %vm238_vm13, %v271_v13, %v254_v2 }
 0x111   :  { %v592_v34 = vsel %vm161_vm3, %v345_v33, %v168_v32 }
 0x112   :  { %v175_v35 = vmul.f32 0.9, %v592_v34  ;;  %vm171_vm4 = vcmp.gt.f32.partialorder %v592_v34, 0.5  ;;  %v222_v61 = vrot.slane %v592_v34, 5 }
 0x113   :  { %vm172_vm12 = vmand %vm171_vm4, %vm132_vm6 }
 0x114   :  { %v178_v37 = vadd.f32 %v176_v36, %v175_v35  ;;  %v346_v59 = vsel %vm172_vm12, 1.0, %v528_v0  ;;  %v241_v14 = vsel %vm240_vm14, %v239_v7, %v222_v61 }
 0x115   :  { %v257_v10 = vrot.slane %v346_v59, 5 }
 0x116   :  { %v347_v38 = vadd.f32 -0.5, %v178_v37 }
 0x117   :  { %v273_v22 = vsel %vm240_vm14, %v272_v17, %v257_v10 }
 0x118   :  { %v599_v39 = vsel %vm171_vm4, %v347_v38, %v178_v37  ;;  %vm246_vm4 = vcmask 1045504  }
 0x119   :  { %v185_v41 = vmul.f32 0.9, %v599_v39  ;;  %vm181_vm5 = vcmp.gt.f32.partialorder %v599_v39, 0.5  ;;  %v225_v3 = vrot.slane %v599_v39, 4 }
 0x11a   :  { %vm182_vm0 = vmand %vm181_vm5, %vm132_vm6 }
 0x11b   :  { %v188_v43 = vadd.f32 %v186_v42, %v185_v41  ;;  %v348_v63 = vsel %vm182_vm0, 1.0, %v528_v0  ;;  %v243_v18 = vsel %vm242_vm15, %v241_v14, %v225_v3 }
 0x11c   :  { %v260_v12 = vrot.slane %v348_v63, 4 }
 0x11d   :  { %v349_v45 = vadd.f32 -0.5, %v188_v43 }
 0x11e   :  { %v274_v25 = vsel %vm242_vm15, %v273_v22, %v260_v12 }
 0x11f   :  { %v190_v46 = vsel %vm181_vm5, %v349_v45, %v188_v43  ;;  %vm248_vm5 = vcmask 1046528  }
 0x120   :  { %v195_v47 = vmul.f32 0.9, %v190_v46  ;;  %vm191_vm10 = vcmp.gt.f32.partialorder %v190_v46, 0.5  ;;  %v228_v6 = vrot.slane %v190_v46, 3 }
 0x121   :  { %vm192_vm2 = vmand %vm191_vm10, %vm132_vm6 }
 0x122   :  { %v198_v49 = vadd.f32 %v196_v48, %v195_v47  ;;  %v350_v5 = vsel %vm192_vm2, 1.0, %v528_v0  ;;  %v245_v21 = vsel %vm244_vm1, %v243_v18, %v228_v6 }
 0x123   :  { %v263_v16 = vrot.slane %v350_v5, 3 }
 0x124   :  { %v351_v51 = vadd.f32 -0.5, %v198_v49 }
 0x125   :  { %v275_v29 = vsel %vm244_vm1, %v274_v25, %v263_v16 }
 0x126   :  { %v200_v55 = vsel %vm191_vm10, %v351_v51, %v198_v49 }
 0x127   :  { %vm201_vm3 = vcmp.gt.f32.partialorder %v200_v55, 0.5  ;;  %v205_v57 = vmul.f32 0.9, %v200_v55  ;;  %v231_v11 = vrot.slane %v200_v55, 2 }
 0x128   :  { %vm202_vm7 = vmand %vm201_vm3, %vm132_vm6 }
 0x129   :  { %v208_v1 = vadd.f32 %v206_v58, %v205_v57  ;;  %v352_v8 = vsel %vm202_vm7, 1.0, %v528_v0  ;;  %v247_v23 = vsel %vm246_vm4, %v245_v21, %v231_v11 }
 0x12a   :  { %v266_v19 = vrot.slane %v352_v8, 2 }
 0x12b   :  { %v353_v9 = vadd.f32 -0.5, %v208_v1 }
 0x12c   :  { %v276_v30 = vsel %vm246_vm4, %v275_v29, %v266_v19 }
 0x12d   :  { %v210_v15 = vsel %vm201_vm3, %v353_v9, %v208_v1 }
 0x12e   :  { %vm211_vm8 = vcmp.gt.f32.partialorder %v210_v15, 0.5  ;;  %v234_v20 = vrot.slane %v210_v15, 1 }
 0x12f   :  { %vm212_vm9 = vmand %vm211_vm8, %vm132_vm6 }
 0x130   :  { %v354_v24 = vsel %vm212_vm9, 1.0, %v528_v0  ;;  %v249_v26 = vsel %vm248_vm5, %v247_v23, %v234_v20 }
 0x131   :  { %v269_v28 = vrot.slane %v354_v24, 1  ;;  %278 = vst [vmem:[#allocation7] sm:$0xff] %v249_v26 }
 0x132   :  { %467 = shalt.err (!%p464_p0)
}
 0x133   :  { %305 = dma.vmem_to_hbm [thread:$0]  %s303_s1, 128, %s681_s2, [#allocation4]   ;;  %v277_v0 = vsel %vm248_vm5, %v276_v30, %v269_v28 }
 0x134   :  { %279 = vst [vmem:[#allocation8] sm:$0xff] %v277_v0  ;;  %vm280_vm6 = vcmp.gt.f32.partialorder %v277_v0, 0.0  ;;  %s476_s6 = scalar_lea.vmem %s313_s28, 128  ;;  %p481_p2 = scmp.lt.s32.totalorder %s313_s28, %s313_s28 }
 0x135   :  { %v283_v31 = vsel %vm280_vm6, %v134_v27, 8  ;;  %p477_p1 = scmp.ne.s32.totalorder %s313_s28, %s476_s6  ;;  %p482_p3 = scmp.lt.s32.totalorder %s476_s6, %s476_s6 }
 0x137   :  { %p483_p4 = por %p482_p3, %p481_p2 }
 0x139   :  { %p484_p5 = pnand %p483_p4, %p477_p1 }
 0x13b   :  { %487 = shalt.err (!%p484_p5)
}
 0x13c   :  { %315 = dma.vmem_to_hbm [thread:$0]  %s313_s28, 128, %s682_s3, [#allocation9]   ;;  %v284_v32 = vrot.slane %v283_v31, 4 }
 0x13d   :  { %s532_s2 = smov [#allocation10]  }
 0x13e   :  { %vm285_vm10 = vcmp.lt.s32.totalorder %v283_v31, %v284_v32  ;;  %s322_s9 = sshll.u32 %s532_s2, 4  ;;  %s323_s9 = int_to_ptr.vmem [resolvable:$true] %s322_s9 }
 0x13f   :  { %v286_v33 = vsel %vm285_vm10, %v283_v31, %v284_v32  ;;  %s496_s10 = scalar_lea.vmem %s323_s9, 16  ;;  %s500_s11 = scalar_lea.vmem %s323_s9, 32 }
 0x140   :  { %v287_v34 = vrot.slane %v286_v33, 2  ;;  %p497_p6 = scmp.ne.s32.totalorder %s323_s9, %s496_s10  ;;  %p501_p7 = scmp.lt.s32.totalorder %s323_s9, %s323_s9 }
 0x141   :  { %p502_p8 = scmp.lt.s32.totalorder %s500_s11, %s496_s10 }
 0x142   :  { %vm288_vm11 = vcmp.lt.s32.totalorder %v286_v33, %v287_v34 }
 0x143   :  { %v289_v35 = vsel %vm288_vm11, %v286_v33, %v287_v34  ;;  %p503_p9 = por %p502_p8, %p501_p7 }
 0x144   :  { %v290_v36 = vrot.slane %v289_v35, 1 }
 0x145   :  { %p504_p10 = pnand %p503_p9, %p497_p6 }
 0x146   :  { %vm291_vm12 = vcmp.lt.s32.totalorder %v289_v35, %v290_v36 }
 0x147   :  { %v292_v37 = vsel %vm291_vm12, %v289_v35, %v290_v36 }
 0x148   :  { %vm293_vm13 = vcmp.lt.s32.totalorder %v292_v37, 8 }
 0x149   :  { %v294_v38 = vsel %vm293_vm13, %v292_v37, 8 }
 0x14a   :  { %295 = vst [vmem:[#allocation10] sm:$0x1] %v294_v38 }
 0x14b   :  { %507 = shalt.err (!%p504_p10)
}
 0x14c   :  { %325 = dma.vmem_to_hbm [thread:$0]  %s323_s9, 16, %s683_s4, [#allocation9]  }
 0x14d   :  { %520 = dma.done.wait [#allocation4], 128  }
 0x14e   :  { %521 = vsyncadd [#allocation4], 4294967168 }
 0x14f   :  { %522 = dma.done.wait [#allocation9], 144  }
 0x150   :  { %523 = vsyncadd [#allocation9], 4294967152 }
 0x151   :  { %335 = vsyncpa [#allocation3], 1 }
 0x152   :  { %336 = vsyncpa [#allocation6], 1 }
 0x153   :  { %337 = vsyncpa [#allocation4], 1 }
 0x154   :  { %338 = vsyncpa [#allocation9], 1 }

</bundles_post_ra>
